<compile_context>
chip_gen: v7x
topology: tpu7x:2x2x1
jax: 0.10.0
libtpu: 0.0.40
codegen_flags: <defaults>
</compile_context>

<pallas_src>
import functools
import numpy as np

import jax
import jax.numpy as jnp
from jax import lax
from jax.experimental import pallas as pl
from jax.experimental.pallas import tpu as pltpu

EPS = 1e-5                      # BatchNorm eps (PyTorch default)
TM_MAX = 512                    # row tile over flattened point axis
TN_MAX = 2048                   # column tile for the distance matrix
_VMEM_LIMIT = 48 * 1024 * 1024  # explicit scoped-VMEM limit (fits v7x's 64 MiB)
_MM_DTYPE = jnp.bfloat16        # MXU operand dtype for the main compute kernels


# ---------------------------------------------------------------------------
# small helpers
# ---------------------------------------------------------------------------
def _round_up(x, m):
    return (x + m - 1) // m * m


def _row_tiles(m):
    """Tile size and padded extent for a row dimension of size m.

    Prefers a tile that divides m exactly (no pad/slice HBM copies) and keeps
    at least 2 grid steps when m is large enough (v7x has 2 TensorCores)."""
    if m <= TM_MAX:
        if m >= 256 and m % 16 == 0:
            return m // 2, m          # 2 grid steps, tile still a multiple of 8
        return m, m                   # block == full dim (always legal)
    for tm in range(TM_MAX - TM_MAX % 8, 63, -8):
        if m % tm == 0:
            return tm, m
    return TM_MAX, _round_up(m, TM_MAX)


def _col_tiles(n):
    if n <= TN_MAX:
        return n, n
    for tn in range(TN_MAX, 127, -128):
        if n % tn == 0:
            return tn, n
    return TN_MAX, _round_up(n, TN_MAX)


def _pad_rows(x, m_pad):
    m = x.shape[0]
    if m == m_pad:
        return x
    return jnp.pad(x, [(0, m_pad - m)] + [(0, 0)] * (x.ndim - 1))


def _params(sem):
    return pltpu.CompilerParams(dimension_semantics=sem,
                                vmem_limit_bytes=_VMEM_LIMIT)


def _mm(a, b):
    """bf16 MXU matmul with f32 accumulation (main compute path)."""
    return jnp.dot(a.astype(_MM_DTYPE), b.astype(_MM_DTYPE),
                   preferred_element_type=jnp.float32)


def _mm32(a, b):
    """f32 matmul (BN statistics path — avoids variance cancellation)."""
    return jnp.dot(a.astype(jnp.float32), b.astype(jnp.float32),
                   preferred_element_type=jnp.float32)


def _wspec(w):
    return pl.BlockSpec(w.shape, lambda *idx: (0,) * w.ndim)


def _pos_hidden(pos3, w1, b1):
    """3-wide contraction as VPU broadcast-FMAs (no MXU): pos3 (tm,K,3) -> (tm,K,C)."""
    return (pos3[:, :, 0:1] * w1[0:1, :][None]
            + pos3[:, :, 1:2] * w1[1:2, :][None]
            + pos3[:, :, 2:3] * w1[2:3, :][None]
            + b1[None])


# ---------------------------------------------------------------------------
# pairwise squared distances (tiled over B, N1 and N2; VPU FMAs, no MXU)
# ---------------------------------------------------------------------------
def _dist_kernel(p1_ref, p2t_ref, o_ref):
    a = p1_ref[0]                                     # (TM, 3)
    bt = p2t_ref[0]                                   # (3, TN)  lane-dense in N2
    aa = jnp.sum(a * a, axis=-1, keepdims=True)       # (TM, 1)
    bb = jnp.sum(bt * bt, axis=0, keepdims=True)      # (1, TN)
    cross = (a[:, 0:1] * bt[0:1, :] +
             a[:, 1:2] * bt[1:2, :] +
             a[:, 2:3] * bt[2:3, :])                  # (TM, TN) via broadcasts
    o_ref[0] = aa + bb - 2.0 * cross


def dist_mat(pc1, pc2):
    B, n1, _ = pc1.shape
    n2 = pc2.shape[1]
    tm, n1p = _row_tiles(n1)
    tn, n2p = _col_tiles(n2)
    pc1p = pc1 if n1p == n1 else jnp.pad(pc1, ((0, 0), (0, n1p - n1), (0, 0)))
    pc2t = jnp.transpose(pc2, (0, 2, 1))              # (B, 3, N2)
    if n2p != n2:
        pc2t = jnp.pad(pc2t, ((0, 0), (0, 0), (0, n2p - n2)))
    out = pl.pallas_call(
        _dist_kernel,
        out_shape=jax.ShapeDtypeStruct((B, n1p, n2p), pc1.dtype),
        grid=(B, n1p // tm, n2p // tn),
        in_specs=[pl.BlockSpec((1, tm, 3), lambda b, i, j: (b, i, 0)),
                  pl.BlockSpec((1, 3, tn), lambda b, i, j: (b, 0, j))],
        out_specs=pl.BlockSpec((1, tm, tn), lambda b, i, j: (b, i, j)),
        compiler_params=_params(("parallel", "parallel", "parallel")),
    )(pc1p, pc2t)
    return out[:, :n1, :n2]


# ---------------------------------------------------------------------------
# EncoderGrp: fused Linear -> ReLU -> Linear -> max over K (single kernel)
# ---------------------------------------------------------------------------
def _grp_mlp_max_kernel(x_ref, w1_ref, b1_ref, w2_ref, b2_ref, o_ref):
    tm, K, cin = x_ref.shape
    x2 = x_ref[...].reshape(tm * K, cin)
    h = jnp.maximum(_mm(x2, w1_ref[...]) + b1_ref[...], 0.0)
    y = (_mm(h, w2_ref[...]) + b2_ref[...]).reshape(tm, K, -1)
    o_ref[...] = jnp.max(y, axis=1).astype(o_ref.dtype)


def grp_fc_max(x_grp, w1, b1, w2, b2):
    B, n, K, cin = x_grp.shape
    d = w2.shape[-1]
    M = B * n
    tm, mp = _row_tiles(M)
    x2 = _pad_rows(x_grp.reshape(M, K, cin), mp)
    out = pl.pallas_call(
        _grp_mlp_max_kernel,
        out_shape=jax.ShapeDtypeStruct((mp, d), x_grp.dtype),
        grid=(mp // tm,),
        in_specs=[pl.BlockSpec((tm, K, cin), lambda i: (i, 0, 0)),
                  _wspec(w1), _wspec(b1), _wspec(w2), _wspec(b2)],
        out_specs=pl.BlockSpec((tm, d), lambda i: (i, 0)),
        compiler_params=_params(("parallel",)),
    )(x2, w1, b1, w2, b2)
    return out[:M].reshape(B, n, d)


# ---------------------------------------------------------------------------
# EncoderAttn kernels
# ---------------------------------------------------------------------------
def _qkv_kernel(x_ref, wp_ref, bp_ref, wqkv_ref, bqkv_ref, o_ref):
    # fused pre_fc followed by concatenated q/k/v projection (lane width 3*D)
    xp = _mm(x_ref[...], wp_ref[...]) + bp_ref[...]
    o_ref[...] = (_mm(xp, wqkv_ref[...]) + bqkv_ref[...]).astype(o_ref.dtype)


def _pos_stats_kernel(pos_ref, w1_ref, b1_ref, out_ref, *, tm, m_real, masked):
    # per-tile partial sum / sumsq (rows 0/1 of an (8,C) block) of the pos_fc hidden
    i = pl.program_id(0)
    pos = pos_ref[...]                                          # (tm, K, 3)
    w1 = w1_ref[...]
    h = _pos_hidden(pos, w1, b1_ref[...])                       # (tm, K, PH), f32 VPU
    if masked:
        valid = (lax.broadcasted_iota(jnp.int32, pos.shape[:2] + (1,), 0)
                 < (m_real - i * tm)).astype(h.dtype)
        hv = h * valid
    else:
        hv = h
    s = jnp.sum(jnp.sum(hv, axis=1), axis=0, keepdims=True)     # (1, PH)
    sq = jnp.sum(jnp.sum(hv * h, axis=1), axis=0, keepdims=True)
    row = lax.broadcasted_iota(jnp.int32, out_ref.shape, 0)
    out_ref[...] = jnp.where(row == 0, s, jnp.where(row == 1, sq, 0.0))


def _attn_stats_kernel(q_ref, k_ref, pos_ref,
                       pw1f, pb1f, pw2, pb2, aw1, ab1,
                       out_ref, *, tm, m_real, masked):
    # per-tile partial sum / sumsq of the attn_fc hidden (pos BN already folded)
    i = pl.program_id(0)
    K, D = k_ref.shape[1], k_ref.shape[2]
    tmk = tm * K
    pos = pos_ref[...]
    hp = jnp.maximum(_pos_hidden(pos, pw1f[...], pb1f[...]), 0.0)   # (tm, K, PH)
    pe = _mm32(hp.reshape(tmk, -1), pw2[...]) + pb2[...]            # f32 stats path
    att = (k_ref[...].astype(jnp.float32)
           - q_ref[...].astype(jnp.float32)[:, None, :]
           + pe.reshape(tm, K, D))
    ha = _mm32(att.reshape(tmk, D), aw1[...]) + ab1[...]            # (tmk, AH)
    ha3 = ha.reshape(tm, K, -1)
    if masked:
        valid = (lax.broadcasted_iota(jnp.int32, (tm, K, 1), 0)
                 < (m_real - i * tm)).astype(ha3.dtype)
        hv = ha3 * valid
    else:
        hv = ha3
    s = jnp.sum(jnp.sum(hv, axis=1), axis=0, keepdims=True)         # (1, AH)
    sq = jnp.sum(jnp.sum(hv * ha3, axis=1), axis=0, keepdims=True)
    row = lax.broadcasted_iota(jnp.int32, out_ref.shape, 0)
    out_ref[...] = jnp.where(row == 0, s, jnp.where(row == 1, sq, 0.0))


def _attn_main_kernel(q_ref, k_ref, v_ref, pos_ref, res_ref,
                      pw1f, pb1f, pw2, pb2,
                      aw1f, ab1f, aw2, ab2,
                      wpost, bpost, o_ref):
    tm, K, D = k_ref.shape
    tmk = tm * K
    # pos_fc: 3-wide FMA (BN folded into pw1f/pb1f) -> ReLU -> Linear(PH,D)
    pos = pos_ref[...]
    hp = jnp.maximum(_pos_hidden(pos, pw1f[...], pb1f[...]), 0.0)
    pe3 = (_mm(hp.reshape(tmk, -1), pw2[...]) + pb2[...]).reshape(tm, K, D)
    # attn_fc(k - q + pos), BN folded into aw1f/ab1f
    att = k_ref[...] - q_ref[...][:, None, :] + pe3
    ha = jnp.maximum(_mm(att.reshape(tmk, D), aw1f[...]) + ab1f[...], 0.0)
    a = (_mm(ha, aw2[...]) + ab2[...]).reshape(tm, K, D)
    # softmax over the neighbor axis (torch.softmax(attn, dim=-2))
    a = a - jnp.max(a, axis=1, keepdims=True)
    a = jnp.exp(a)
    a = a * pl.reciprocal(jnp.sum(a, axis=1, keepdims=True), approx=True)
    agg = jnp.sum((v_ref[...] + pe3) * a, axis=1)               # (tm, D)
    # fused post_fc + residual epilogue
    out = _mm(agg, wpost[...]) + bpost[...] + res_ref[...]
    o_ref[...] = out.astype(o_ref.dtype)


def _reduce_partials(part, c):
    nt = part.shape[0] // 8
    part = part.reshape(nt, 8, c)
    return (jnp.sum(part[:, 0, :], axis=0, keepdims=True),
            jnp.sum(part[:, 1, :], axis=0, keepdims=True))


def encoder_attn(feat, pc, p, knn):
    B, n, in_dim = feat.shape
    D = p["q"][0].shape[1]
    PH = p["pos1"][0].shape[1]
    AH = p["attn1"][0].shape[1]
    M = B * n
    residue = feat
    tm, mp = _row_tiles(M)
    nt = mp // tm
    masked = (mp != M)

    # ---- fused pre + q/k/v projections ------------------------------------
    wqkv = jnp.concatenate([p["q"][0], p["k"][0], p["v"][0]], axis=1)
    bqkv = jnp.concatenate([p["q"][1], p["k"][1], p["v"][1]], axis=1)
    feat2 = _pad_rows(feat.reshape(M, in_dim), mp)
    qkv = pl.pallas_call(
        _qkv_kernel,
        out_shape=jax.ShapeDtypeStruct((mp, 3 * D), feat.dtype),
        grid=(nt,),
        in_specs=[pl.BlockSpec((tm, in_dim), lambda i: (i, 0)),
                  _wspec(p["pre"][0]), _wspec(p["pre"][1]),
                  _wspec(wqkv), _wspec(bqkv)],
        out_specs=pl.BlockSpec((tm, 3 * D), lambda i: (i, 0)),
        compiler_params=_params(("parallel",)),
    )(feat2, p["pre"][0], p["pre"][1], wqkv, bqkv)
    qkv = qkv[:M]
    q2 = qkv[:, :D]
    k3 = qkv[:, D:2 * D].reshape(B, n, D)
    v3 = qkv[:, 2 * D:].reshape(B, n, D)

    # ---- KNN grouping (data-dependent: stays in JAX) -----------------------
    k_cat = query_group(k3, pc, pc, knn, cat_pc=True)    # (B,n,K,3+D)
    v_grp = query_group(v3, pc, pc, knn, cat_pc=False)   # (B,n,K,D)
    pos_rel, k_grp = k_cat[..., :3], k_cat[..., 3:]

    q_p = _pad_rows(q2, mp)
    k_p = _pad_rows(k_grp.reshape(M, knn, D), mp)
    v_p = _pad_rows(v_grp.reshape(M, knn, D), mp)
    pos_p = _pad_rows(pos_rel.reshape(M, knn, 3), mp)
    res_p = _pad_rows(residue.reshape(M, in_dim), mp)
    count = float(M * knn)

    pw1, pb1 = p["pos1"]; pgam, pbet = p["pos_bn"]; pw2, pb2 = p["pos2"]
    aw1, ab1 = p["attn1"]; agam, abet = p["attn_bn"]; aw2, ab2 = p["attn2"]
    wpost, bpost = p["post"]

    # ---- pass 1: pos_fc BatchNorm batch statistics (grid-parallel partials) --
    # TODO(synk): running-stat tracking (train-time side effect) is not modeled;
    # normalization uses biased batch statistics exactly like PyTorch train mode.
    pos_part = pl.pallas_call(
        functools.partial(_pos_stats_kernel, tm=tm, m_real=M, masked=masked),
        out_shape=jax.ShapeDtypeStruct((8 * nt, PH), jnp.float32),
        grid=(nt,),
        in_specs=[pl.BlockSpec((tm, knn, 3), lambda i: (i, 0, 0)),
                  _wspec(pw1), _wspec(pb1)],
        out_specs=pl.BlockSpec((8, PH), lambda i: (i, 0)),
        compiler_params=_params(("parallel",)),
    )(pos_p, pw1, pb1)
    pos_sum, pos_sq = _reduce_partials(pos_part, PH)
    p_mu = pos_sum / count
    p_var = jnp.maximum(pos_sq / count - p_mu * p_mu, 0.0)
    p_scale = pgam * lax.rsqrt(p_var + EPS)
    p_shift = pbet - p_mu * p_scale
    # fold BN scale/shift into the preceding 3->PH linear
    pw1f = pw1 * p_scale
    pb1f = pb1 * p_scale + p_shift

    # ---- pass 2: attn_fc BatchNorm batch statistics (grid-parallel partials) --
    attn_part = pl.pallas_call(
        functools.partial(_attn_stats_kernel, tm=tm, m_real=M, masked=masked),
        out_shape=jax.ShapeDtypeStruct((8 * nt, AH), jnp.float32),
        grid=(nt,),
        in_specs=[pl.BlockSpec((tm, D), lambda i: (i, 0)),
                  pl.BlockSpec((tm, knn, D), lambda i: (i, 0, 0)),
                  pl.BlockSpec((tm, knn, 3), lambda i: (i, 0, 0)),
                  _wspec(pw1f), _wspec(pb1f), _wspec(pw2), _wspec(pb2),
                  _wspec(aw1), _wspec(ab1)],
        out_specs=pl.BlockSpec((8, AH), lambda i: (i, 0)),
        compiler_params=_params(("parallel",)),
    )(q_p, k_p, pos_p, pw1f, pb1f, pw2, pb2, aw1, ab1)
    attn_sum, attn_sq = _reduce_partials(attn_part, AH)
    a_mu = attn_sum / count
    a_var = jnp.maximum(attn_sq / count - a_mu * a_mu, 0.0)
    a_scale = agam * lax.rsqrt(a_var + EPS)
    a_shift = abet - a_mu * a_scale
    # fold BN scale/shift into the preceding D->AH linear
    aw1f = aw1 * a_scale
    ab1f = ab1 * a_scale + a_shift

    # ---- pass 3: tiled main attention kernel (post_fc + residual fused) -----
    out = pl.pallas_call(
        _attn_main_kernel,
        out_shape=jax.ShapeDtypeStruct((mp, in_dim), feat.dtype),
        grid=(nt,),
        in_specs=[pl.BlockSpec((tm, D), lambda i: (i, 0)),
                  pl.BlockSpec((tm, knn, D), lambda i: (i, 0, 0)),
                  pl.BlockSpec((tm, knn, D), lambda i: (i, 0, 0)),
                  pl.BlockSpec((tm, knn, 3), lambda i: (i, 0, 0)),
                  pl.BlockSpec((tm, in_dim), lambda i: (i, 0)),
                  _wspec(pw1f), _wspec(pb1f), _wspec(pw2), _wspec(pb2),
                  _wspec(aw1f), _wspec(ab1f), _wspec(aw2), _wspec(ab2),
                  _wspec(wpost), _wspec(bpost)],
        out_specs=pl.BlockSpec((tm, in_dim), lambda i: (i, 0)),
        compiler_params=_params(("parallel",)),
    )(q_p, k_p, v_p, pos_p, res_p,
      pw1f, pb1f, pw2, pb2, aw1f, ab1f, aw2, ab2, wpost, bpost)
    return out[:M].reshape(B, n, in_dim)


# ---------------------------------------------------------------------------
# final classifier head: tiled mean over points + one batched Linear
# ---------------------------------------------------------------------------
def _mean_fc_kernel(x_ref, w_ref, b_ref, o_ref, acc_ref, *, n_total):
    i = pl.program_id(0)

    @pl.when(i == 0)
    def _():
        acc_ref[...] = jnp.zeros_like(acc_ref)

    acc_ref[...] += jnp.sum(x_ref[...].astype(jnp.float32), axis=1)   # (B, d)

    @pl.when(i == pl.num_programs(0) - 1)
    def _():
        mean = acc_ref[...] * (1.0 / n_total)
        o_ref[...] = (_mm(mean, w_ref[...]) + b_ref[...]).astype(o_ref.dtype)


def mean_fc(feat, wf, bf):
    B, n, d = feat.shape
    ncls = wf.shape[1]
    tn, npad = _row_tiles(n)
    if npad != n:
        feat = jnp.pad(feat, ((0, 0), (0, npad - n), (0, 0)))  # zeros don't bias the sum
    out = pl.pallas_call(
        functools.partial(_mean_fc_kernel, n_total=float(n)),
        out_shape=jax.ShapeDtypeStruct((B, ncls), feat.dtype),
        grid=(npad // tn,),
        in_specs=[pl.BlockSpec((B, tn, d), lambda i: (0, i, 0)),
                  _wspec(wf), _wspec(bf)],
        out_specs=pl.BlockSpec((B, ncls), lambda i: (0, 0)),
        scratch_shapes=[pltpu.VMEM((B, d), jnp.float32)],
        compiler_params=_params(("arbitrary",)),
    )(feat, wf, bf)
    return out


# ---------------------------------------------------------------------------
# data-dependent glue (plain JAX): KNN top-k, gather, FPS
# ---------------------------------------------------------------------------
def _gather(x, idx):
    # x: (B, N2, C), idx: (B, N1, K) -> (B, N1, K, C)
    return jax.vmap(lambda xb, ib: xb[ib])(x, idx)


def query_group(x, pc1, pc2, grp_size, cat_pc=False):
    mat = dist_mat(pc1, pc2)                          # Pallas kernel
    _, knn_idx = lax.top_k(-mat, grp_size)            # k smallest, sorted
    knn_pc = _gather(pc2, knn_idx) - pc1[:, :, None, :]
    knn_x = _gather(x, knn_idx)
    if cat_pc:
        return jnp.concatenate([knn_pc, knn_x], axis=-1)
    return knn_x


def fps(pc, n_samples):
    """Greedy farthest point sampling seeded at point 0 (sequential, stays in JAX)."""
    def single(p):
        n = p.shape[0]

        def body(i, state):
            idx, dists = state
            last = p[idx[i - 1]]
            d = jnp.sum((p - last) ** 2, axis=-1)
            dists = jnp.minimum(dists, d)
            idx = idx.at[i].set(jnp.argmax(dists).astype(jnp.int32))
            return idx, dists

        idx0 = jnp.zeros((n_samples,), jnp.int32)
        d0 = jnp.full((n,), jnp.inf, dtype=p.dtype)
        idx, _ = lax.fori_loop(1, n_samples, body, (idx0, d0))
        return p[idx]

    return jax.vmap(single)(pc)


# ---------------------------------------------------------------------------
# parameters (deterministic init, PyTorch-Linear-style uniform)
# ---------------------------------------------------------------------------
def _init_linear(key, din, dout):
    kw, kb = jax.random.split(key)
    bound = 1.0 / np.sqrt(din)
    w = jax.random.uniform(kw, (din, dout), jnp.float32, -bound, bound)
    b = jax.random.uniform(kb, (1, dout), jnp.float32, -bound, bound)
    return w, b


def init_params(key, dims, knn_sizes, down_ratio, block_sizes,
                attn_dim, pos_hid_dim, attn_hid_dim, n_cls):
    params = {"blocks": []}
    in_dim = 3
    for i, (dim, knn, bsz) in enumerate(zip(dims, knn_sizes, block_sizes)):
        key, k1, k2 = jax.random.split(key, 3)
        grp = {"fc1": _init_linear(k1, 3 + in_dim, dim),
               "fc2": _init_linear(k2, dim, dim)}
        attns = []
        for _ in range(bsz):
            key, *ks = jax.random.split(key, 10)
            attns.append({
                "pre": _init_linear(ks[0], dim, attn_dim),
                "q": _init_linear(ks[1], attn_dim, attn_dim),
                "k": _init_linear(ks[2], attn_dim, attn_dim),
                "v": _init_linear(ks[3], attn_dim, attn_dim),
                "pos1": _init_linear(ks[4], 3, pos_hid_dim),
                "pos_bn": (jnp.ones((1, pos_hid_dim), jnp.float32),
                           jnp.zeros((1, pos_hid_dim), jnp.float32)),
                "pos2": _init_linear(ks[5], pos_hid_dim, attn_dim),
                "attn1": _init_linear(ks[6], attn_dim, attn_hid_dim),
                "attn_bn": (jnp.ones((1, attn_hid_dim), jnp.float32),
                            jnp.zeros((1, attn_hid_dim), jnp.float32)),
                "attn2": _init_linear(ks[7], attn_hid_dim, attn_dim),
                "post": _init_linear(ks[8], attn_dim, dim),
            })
        params["blocks"].append({"grp": grp, "attn": attns, "knn": knn,
                                 "down_ratio": 1 if i == 0 else down_ratio})
        in_dim = dim
    key, kf = jax.random.split(key)
    params["fc"] = _init_linear(kf, dims[-1], n_cls)
    return params


# ---------------------------------------------------------------------------
# forward pass
# ---------------------------------------------------------------------------
def classification_forward(params, pc):
    feat = pc                  # forward is called as encoder((x, x))
    cur_pc = pc
    for blk in params["blocks"]:
        knn, dr = blk["knn"], blk["down_ratio"]
        pc_fps = fps(cur_pc, cur_pc.shape[1] // dr) if dr != 1 else cur_pc
        grouped = query_group(feat, pc_fps, cur_pc, knn, cat_pc=True)
        (w1, b1), (w2, b2) = blk["grp"]["fc1"], blk["grp"]["fc2"]
        feat = grp_fc_max(grouped, w1, b1, w2, b2)
        cur_pc = pc_fps
        for ap in blk["attn"]:
            feat = encoder_attn(feat, cur_pc, ap, knn)
    wf, bf = params["fc"]
    return mean_fc(feat, wf, bf)


# ---------------------------------------------------------------------------
if __name__ == "__main__":
    key = jax.random.PRNGKey(0)
    kx, kp = jax.random.split(key)

    B, N = 2, 16
    dims = (16, 32)
    knn_sizes = (4, 4)
    down_ratio = 2
    block_sizes = (1, 1)
    attn_dim = 32
    pos_hid_dim = 16
    attn_hid_dim = 16
    n_cls = 5

    x = jax.random.normal(kx, (B, N, 3), jnp.float32)
    params = init_params(kp, dims, knn_sizes, down_ratio, block_sizes,
                         attn_dim, pos_hid_dim, attn_hid_dim, n_cls)

    logits = classification_forward(params, x)
    logits = jax.block_until_ready(logits)
    assert logits.shape == (B, n_cls), logits.shape
    assert bool(jnp.all(jnp.isfinite(logits)))
    print("KERNEL_OK")
</pallas_src>

<mosaic_0001>
module attributes {stable_mosaic.version = 11 : i64} {
  func.func @_dist_kernel(%arg0: i32, %arg1: i32, %arg2: i32, %arg3: memref<1x16x3xf32, #tpu.memory_space<vmem>>, %arg4: memref<1x3x16xf32, #tpu.memory_space<vmem>>, %arg5: memref<1x16x16xf32, #tpu.memory_space<vmem>>) attributes {dimension_semantics = [#tpu.dimension_semantics<parallel>, #tpu.dimension_semantics<parallel>, #tpu.dimension_semantics<parallel>], iteration_bounds = array<i64: 2, 1, 1>, scalar_prefetch = 0 : i64, scratch_operands = 0 : i64, tpu.core_type = #tpu.core_type<tc>, window_params = [{transform_indices = @transform_0, window_bounds = array<i64: 1, 16, 3>}, {transform_indices = @transform_1, window_bounds = array<i64: 1, 3, 16>}, {transform_indices = @transform_2, window_bounds = array<i64: 1, 16, 16>}]} {
    %c0 = arith.constant 0 : index
    %c0_0 = arith.constant 0 : index
    %c0_1 = arith.constant 0 : index
    %0 = vector.load %arg3[%c0, %c0_0, %c0_1] : memref<1x16x3xf32, #tpu.memory_space<vmem>>, vector<1x16x3xf32>
    %1 = vector.shape_cast %0 : vector<1x16x3xf32> to vector<16x3xf32>
    %c0_2 = arith.constant 0 : index
    %c0_3 = arith.constant 0 : index
    %c0_4 = arith.constant 0 : index
    %2 = vector.load %arg4[%c0_2, %c0_3, %c0_4] : memref<1x3x16xf32, #tpu.memory_space<vmem>>, vector<1x3x16xf32>
    %3 = vector.shape_cast %2 : vector<1x3x16xf32> to vector<3x16xf32>
    %4 = arith.mulf %1, %1 : vector<16x3xf32>
    %cst = arith.constant dense<0.000000e+00> : vector<16xf32>
    %5 = vector.multi_reduction <add>, %4, %cst [1] : vector<16x3xf32> to vector<16xf32>
    %6 = vector.shape_cast %5 : vector<16xf32> to vector<16x1xf32>
    %7 = arith.mulf %3, %3 : vector<3x16xf32>
    %cst_5 = arith.constant dense<0.000000e+00> : vector<16xf32>
    %8 = vector.multi_reduction <add>, %7, %cst_5 [0] : vector<3x16xf32> to vector<16xf32>
    %9 = vector.shape_cast %8 : vector<16xf32> to vector<1x16xf32>
    %10 = vector.extract_strided_slice %1 {offsets = [0, 0], sizes = [16, 1], strides = [1, 1]} : vector<16x3xf32> to vector<16x1xf32>
    %11 = vector.extract_strided_slice %3 {offsets = [0, 0], sizes = [1, 16], strides = [1, 1]} : vector<3x16xf32> to vector<1x16xf32>
    %12 = vector.broadcast %10 : vector<16x1xf32> to vector<16x16xf32>
    %13 = vector.broadcast %11 : vector<1x16xf32> to vector<16x16xf32>
    %14 = arith.mulf %12, %13 : vector<16x16xf32>
    %15 = vector.extract_strided_slice %1 {offsets = [0, 1], sizes = [16, 1], strides = [1, 1]} : vector<16x3xf32> to vector<16x1xf32>
    %16 = vector.extract_strided_slice %3 {offsets = [1, 0], sizes = [1, 16], strides = [1, 1]} : vector<3x16xf32> to vector<1x16xf32>
    %17 = vector.broadcast %15 : vector<16x1xf32> to vector<16x16xf32>
    %18 = vector.broadcast %16 : vector<1x16xf32> to vector<16x16xf32>
    %19 = arith.mulf %17, %18 : vector<16x16xf32>
    %20 = arith.addf %14, %19 : vector<16x16xf32>
    %21 = vector.extract_strided_slice %1 {offsets = [0, 2], sizes = [16, 1], strides = [1, 1]} : vector<16x3xf32> to vector<16x1xf32>
    %22 = vector.extract_strided_slice %3 {offsets = [2, 0], sizes = [1, 16], strides = [1, 1]} : vector<3x16xf32> to vector<1x16xf32>
    %23 = vector.broadcast %21 : vector<16x1xf32> to vector<16x16xf32>
    %24 = vector.broadcast %22 : vector<1x16xf32> to vector<16x16xf32>
    %25 = arith.mulf %23, %24 : vector<16x16xf32>
    %26 = arith.addf %20, %25 : vector<16x16xf32>
    %27 = vector.broadcast %6 : vector<16x1xf32> to vector<16x16xf32>
    %28 = vector.broadcast %9 : vector<1x16xf32> to vector<16x16xf32>
    %29 = arith.addf %27, %28 : vector<16x16xf32>
    %cst_6 = arith.constant 2.000000e+00 : f32
    %30 = vector.broadcast %cst_6 : f32 to vector<16x16xf32>
    %31 = arith.mulf %30, %26 : vector<16x16xf32>
    %32 = arith.subf %29, %31 : vector<16x16xf32>
    %c0_7 = arith.constant 0 : index
    %c0_8 = arith.constant 0 : index
    %c0_9 = arith.constant 0 : index
    %33 = vector.load %arg5[%c0_7, %c0_8, %c0_9] : memref<1x16x16xf32, #tpu.memory_space<vmem>>, vector<1x16x16xf32>
    %34 = vector.shape_cast %33 : vector<1x16x16xf32> to vector<16x16xf32>
    %35 = vector.shape_cast %32 : vector<16x16xf32> to vector<1x16x16xf32>
    tpu.vector_store %arg5[%c0_7, %c0_8, %c0_9], %35 {strides = array<i32>} : memref<1x16x16xf32, #tpu.memory_space<vmem>>, vector<1x16x16xf32>,
    return
  }
  func.func @transform_0(%arg0: i32, %arg1: i32, %arg2: i32) -> (i32, i32, i32) {
    %c0_i32 = arith.constant 0 : i32
    %c0_i32_0 = arith.constant 0 : i32
    return %arg0, %arg1, %c0_i32 : i32, i32, i32
  }
  func.func @transform_1(%arg0: i32, %arg1: i32, %arg2: i32) -> (i32, i32, i32) {
    %c0_i32 = arith.constant 0 : i32
    %c0_i32_0 = arith.constant 0 : i32
    return %arg0, %c0_i32, %arg2 : i32, i32, i32
  }
  func.func @transform_2(%arg0: i32, %arg1: i32, %arg2: i32) -> (i32, i32, i32) {
    %c0_i32 = arith.constant 0 : i32
    return %arg0, %arg1, %arg2 : i32, i32, i32
  }
}

</mosaic_0001>

<bundles_post_ra>
// kernel: tpu_custom_call.1
= control target key start
LH: loop header
LB: loop body
LE: loop exit
PB: predicated region body
PF: predicated region fallthrough
CT: control target
= control target key end

     0   :  { %7 = vsyncpa [#allocation3], 0  ;;  %s705_s0 = inlined_call_operand.vmem [shape: f32[2,16,3], index: 0, kind: input, shape index: {}]   ;;  %s706_s1 = inlined_call_operand.vmem [shape: f32[2,3,16], index: 1, kind: input, shape index: {}]   ;;  %s707_s2 = inlined_call_operand.hbm [shape: f32[2,16,16], index: 2, kind: output, shape index: {}]  }
   0x1   :  { %9 = vsyncpa [#allocation3 + $0x1], 0  ;;  %s585_s9 = smov 0   ;;  %s587_s10 = smov 0  }
   0x2   :  { %s589_s11 = smov 0   ;;  %s591_s12 = smov 0  }
   0x3   :  { %s593_s13 = smov 0   ;;  %s595_s14 = smov 0  }
   0x4 LB: > { %s403_s15 = sadd.s32 4294967295, %s562_s14   ;;  %s404_s16 = sadd.s32 4294967294, %s562_s14   ;;  %s562_s14 = sphi %s595_s14, %s15_s14   ;;  %s558_s13 = sphi %s593_s13, %s714_s13   ;;  %s554_s12 = sphi %s591_s12, %s713_s12   ;;  %s550_s11 = sphi %s589_s11, %s712_s11   ;;  %s546_s10 = sphi %s587_s10, %s711_s10   ;;  %s542_s9 = sphi %s585_s9, %s710_s9  }
   0x5   : > { %s34_s17 = sadd.s32 1, %s558_s13  ;;  %s101_s18 = sadd.s32 1, %s550_s11 }
   0x6   : > { %p36_p0 = scmp.ge.s32.totalorder %s34_s17, 2  ;;  %p111_p1 = scmp.ne.s32.totalorder %s550_s11, %s546_s10 }
   0x7   : > { %p112_p2 = scmp.eq.s32.totalorder %s403_s15, 1  ;;  %p117_p3 = scmp.ne.s32.totalorder %s546_s10, %s542_s9 }
   0x8   : > { %s716_s17 = smov (%p36_p0, %s34_s17), 0  ;;  %p118_p5 = scmp.eq.s32.totalorder %s404_s16, 1 }
   0x9   : > { %p625_p4 = por %p112_p2, %p111_p1  ;;  %s94_s20 = ssub.s32 %s558_s13, %s716_s17 }
   0xa   : > { %p407_p6 = scmp.ge.s32.totalorder %s562_s14, 1  ;;  %p99_p7 = scmp.eq.s32.totalorder %s94_s20, 0 }
   0xb   : > { %p632_p8 = por %p118_p5, %p117_p3  ;;  %p159_p9 = scmp.lt.s32.totalorder %s562_s14, 3 }
   0xc   : > { %s638_s22 = scalar_select %p99_p7, %s550_s11, %s101_s18  }
   0xd   : > { %p160_p10 = pnand %p407_p6, %p159_p9 }
   0xe   : > { %p193_p11 = scmp.lt.s32.totalorder (!%p160_p10), %s554_s12, 1  ;;  %v564_v0 = vmov (!%p160_p10), 0   ;;  %v565_v1 = vmov (!%p160_p10), 1   ;;  %vm215_vm0 = vcmask (!%p160_p10), 23552   ;;  %v566_v8 = vmov (!%p160_p10), 2   ;;  %s189_s4 = sand.u32 (!%p160_p10), 1, %s546_s10  }
   0xf   : > { %163 = sbr.rel (%p160_p10) target bundleno = 209 (0xd1), region = 28  ;;  %479 = vset.pattern.permute.xlu1 (!%p160_p10), %v564_v0  ;;  %480 = vset.pattern.permute.xlu0 (!%p160_p10), %v565_v1  ;;  %vm223_vm1 = vcmask (!%p160_p10), 124928   ;;  %v241_v12 = vlaneseq (!%p160_p10)  ;;  %s408_s5 = sshll.u32 (!%p160_p10), %s189_s4, 4  ;;  %vm285_vm2 = vcmask (!%p160_p10), 130048  }
  0x10   : > { %s191_s6 = scalar_lea.vmem (!%p160_p10), [#allocation2], %s408_s5  ;;  %s418_s8 = sshll.u32 (!%p160_p10), %s554_s12, 8 }
  0x11   : > { %v242_v15 = vshrl.u32 (!%p160_p10), %v241_v12, 7  ;;  %s305_s7 = sshll.u32 (!%p160_p10), %s191_s6, 4  ;;  %s654_s18 = scalar_lea.hbm (!%p160_p10), %s707_s2, %s418_s8  ;;  %s656_s7 = int_to_ptr.vmem [resolvable:$true] %s305_s7 }
  0x12   : > { %s659_s20 = scalar_lea.sflag (!%p160_p10), [#allocation3], %s189_s4 }
  0x13   : > { %v243_v18 = vsub.s32 (!%p160_p10), 0, %v242_v15  ;;  %v257_v19 = vsub.s32 (!%p160_p10), 1, %v242_v15  ;;  %v273_v24 = vsub.s32 (!%p160_p10), 2, %v242_v15 }
  0x16   : > { %s194_s23 = scalar_select %p193_p11, %s554_s12, 1 }
  0x17   : > { %s567_s12 = smov [#allocation2]  }
  0x18   : > { %s417_s24 = sshll.u32 %s194_s23, 4  ;;  %s411_s28 = sshll.u32 %s194_s23, 2 }
  0x19   : > { %s200_s27 = scalar_lea.vmem %s705_s0, %s417_s24  ;;  %s208_s3 = scalar_lea.vmem %s706_s1, %s411_s28 }
  0x1a   : > { %v210_v2 = vld [vmem:[%s200_s27] sm:$0xff]  ;;  %v211_v3 = vld [vmem:[%s200_s27 + $0x8] sm:$0xff]  ;;  %s484_s23 = scalar_lea.vmem %s656_s7, 256  ;;  %s488_s24 = sshll.u32 %s567_s12, 4  ;;  %s489_s24 = int_to_ptr.vmem [resolvable:$false] %s488_s24 }
  0x1b   : > { %233 = vperm.xlu1 %479, %v210_v2   ;;  %v213_v4 = vmul.f32 %v210_v2, %v210_v2  ;;  %v214_v5 = vmul.f32 %v211_v3, %v211_v3  ;;  %v212_v9 = vld [vmem:[%s208_s3] sm:$0x7]  ;;  %p485_p12 = scmp.ne.s32.totalorder %s656_s7, %s484_s23  ;;  %s490_s25 = scalar_lea.vmem %s489_s24, 512 }
  0x1c   : > { %v222_v10 = vmul.f32 %v212_v9, %v212_v9  ;;  %v244_v22 = vrot.slane %v212_v9, %v243_v18  ;;  %v258_v23 = vrot.slane %v212_v9, %v257_v19  ;;  %v274_v29 = vrot.slane %v212_v9, %v273_v24  ;;  %p491_p1 = scmp.lt.s32.totalorder %s656_s7, %s489_s24  ;;  %p492_p2 = scmp.lt.s32.totalorder %s490_s25, %s484_s23 }
  0x1d   : > { %v216_v6 = vsel %vm215_vm0, %v213_v4, 0.0  ;;  %v219_v7 = vsel %vm215_vm0, %v214_v5, 0.0  ;;  %p486_p13 = pnand %p485_p12, %p625_p4 }
  0x1e   : > { %217 = vadd.xlane.f32.xlu0 %v216_v6  ;;  %v224_v11 = vsel %vm223_vm1, %v222_v10, 0.0  ;;  %p493_p3 = por %p492_p2, %p491_p1 }
  0x1f   : > { %238 = vperm.xlu1 %479, %v211_v3   ;;  %v225_v14 = vrot.slane %v224_v11, 4  ;;  %p487_p0 = pneg %p486_p13 }
  0x21   : > { %v226_v17 = vadd.f32 %v225_v14, %v224_v11  ;;  %p494_p5 = pnand %p493_p3, %p487_p0 }
  0x22   : > { %220 = vadd.xlane.f32.xlu0 %v219_v7 }
  0x23   : > { %481 = vset.pattern.permute.xlu1 %v565_v1  ;;  %v227_v20 = vrot.slane %v226_v17, 2 }
  0x24   : > { %252 = vperm.xlu1 %481, %v211_v3  }
  0x25   : > { %v228_v25 = vadd.f32 %v227_v20, %v226_v17 }
  0x27   : > { %v229_v30 = vrot.slane %v228_v25, 1 }
  0x28   : > { %482 = vset.pattern.permute.xlu1 %v566_v8 }
  0x29   : > { %264 = vperm.xlu1 %482, %v210_v2   ;;  %v230_v35 = vadd.f32 %v229_v30, %v228_v25 }
  0x2d   : > { %268 = vperm.xlu1 %482, %v211_v3  }
  0x38   : > { %248 = vperm.xlu0 %480, %v210_v2  }
  0x3c   : > { %483 = vset.pattern.permute.xlu0 %v566_v8 }
  0x9a   : > { %v234_v13 = vpop.permute.xlu1 %233 }
  0x9b   : > { %v245_v42 = vmul.f32 %v244_v22, %v234_v13 }
  0x9e   : > { %v239_v16 = vpop.permute.xlu1 %238 }
  0x9f   : > { %v246_v27 = vmul.f32 %v244_v22, %v239_v16 }
  0xa3   : > { %v253_v21 = vpop.permute.xlu1 %252 }
  0xa4   : > { %v260_v28 = vmul.f32 %v258_v23, %v253_v21 }
  0xa6   : > { %v262_v33 = vadd.f32 %v260_v28, %v246_v27 }
  0xa8   : > { %v265_v26 = vpop.permute.xlu1 %264 }
  0xa9   : > { %v275_v44 = vmul.f32 %v274_v29, %v265_v26 }
  0xab   : > { %v218_v31 = vpop.xlane.xlu0 %217 }
  0xac   : > { %v269_v32 = vpop.permute.xlu1 %268  ;;  %v279_v47 = vadd.f32 %v230_v35, %v218_v31 }
  0xad   : > { %v276_v34 = vmul.f32 %v274_v29, %v269_v32 }
  0xaf   : > { %v278_v36 = vadd.f32 %v276_v34, %v262_v33  ;;  %v221_v37 = vpop.xlane.xlu0 %220 }
  0xb0   : > { %v280_v38 = vadd.f32 %v230_v35, %v221_v37 }
  0xb1   : > { %v282_v39 = vmul.f32 2.0, %v278_v36 }
  0xb3   : > { %v284_v40 = vsub.f32 %v280_v38, %v282_v39 }
  0xb5   : > { %287 = vst.msk [vmem:[%s191_s6 + $0x8] sm:$0xff] %vm285_vm2, %v284_v40 }
  0xb7   : > { %v249_v41 = vpop.permute.xlu0 %248 }
  0xb8   : > { %v259_v43 = vmul.f32 %v258_v23, %v249_v41 }
  0xba   : > { %v261_v45 = vadd.f32 %v259_v43, %v245_v42 }
  0xbc   : > { %v277_v46 = vadd.f32 %v275_v44, %v261_v45 }
  0xbe   : > { %v281_v48 = vmul.f32 2.0, %v277_v46 }
  0xc0   : > { %v283_v49 = vsub.f32 %v279_v47, %v281_v48 }
  0xc2   : > { %286 = vst.msk [vmem:[%s191_s6] sm:$0xff] %vm285_vm2, %v283_v49 }
  0xc3   : > { %497 = shalt.err (!%p494_p5)
}
  0xc4   : > { %s498_s26 = scalar_lea.hbm %s654_s18, 256  ;;  %s502_s29 = scalar_lea.hbm %s707_s2, 512 }
  0xc5   : > { %p499_p6 = scmp.ne.s32.totalorder %s654_s18, %s498_s26  ;;  %p503_p10 = scmp.lt.u32.totalorder %s654_s18, %s707_s2 }
  0xc6   : > { %p504_p11 = scmp.lt.u32.totalorder %s502_s29, %s498_s26  ;;  %p506_p13 = scmp.lt.u32.totalorder %s498_s26, %s654_s18 }
  0xc7   : > { %p500_p7 = pnand %p499_p6, %p625_p4 }
  0xc8   : > { %p505_p12 = por %p504_p11, %p503_p10 }
  0xc9   : > { %p501_p9 = pneg %p500_p7 }
  0xca   : > { %p507_p0 = por %p506_p13, %p505_p12 }
  0xcc   : > { %p508_p1 = pnand %p507_p0, %p501_p9 }
  0xce   : > { %511 = shalt.err (!%p508_p1)
}
  0xcf   : > { %s568_s4 = smov 128   ;;  %s569_s5 = smov 8  }
  0xd0   : > { %419 = dma.vmem_to_hbm [thread:$0]  (%p625_p4), %s656_s7, 256, %s654_s18, %s659_s20, %s568_s4, %s568_s4, %s569_s5  }
  0xd1 PF: > { %p425_p2 = scmp.ge.s32.totalorder %s562_s14, 2  ;;  %s320_s6 = sand.u32 1, %s542_s9  }
  0xd2   : > { %s321_s8 = scalar_lea.sflag [#allocation3], %s320_s6 }
  0xd3   : > { %p422_p3 = pnand %p425_p2, %p632_p8 }
  0xd5   : > { %537 = dma.done.wait (!%p422_p3), %s321_s8, 256  }
  0xd6   : > { %539 = vsyncadd (!%p422_p3), %s321_s8, 4294967040  ;;  %s15_s14 = sadd.s32 1, %s562_s14   ;;  %s710_s9 = smov %s546_s10 }
  0xd7   : > { %p12_p5 = scmp.ge.s32.totalorder %s15_s14, 4   ;;  %s711_s10 = smov %s550_s11 }
  0xd8   : > { %s712_s11 = smov %s638_s22  ;;  %s713_s12 = smov %s558_s13 }
  0xd9   : > { %s714_s13 = smov %s716_s17  ;;  %14 = sbr.rel (!%p12_p5) target bundleno = 4 (0x4), region = 66 }
  0xe0   :  { %326 = vsyncpa [#allocation3], 1 }
  0xe1   :  { %328 = vsyncpa [#allocation3 + $0x1], 1 }

</bundles_post_ra>
